<compile_context>
chip_gen: v7x
topology: tpu7x:2x2x1
jax: 0.10.0
libtpu: 0.0.40
codegen_flags: <defaults>
</compile_context>

<pallas_src>
import jax
import jax.numpy as jnp
import numpy as np
from jax import lax
from jax.experimental import pallas as pl
from jax.experimental.pallas import tpu as pltpu


def _softplus(x):
    # numerically-stable softplus (matches torch.nn.Softplus semantics)
    return jnp.maximum(x, 0.0) + jnp.log1p(jnp.exp(-jnp.abs(x)))


def _sigmoid(x):
    return 1.0 / (1.0 + jnp.exp(-x))


def _softplus_sigmoid(x):
    """softplus(x) and sigmoid(x) from one shared exp(-|x|) (general sign)."""
    t = jnp.exp(-jnp.abs(x))
    inv1pt = 1.0 / (1.0 + t)
    sp = jnp.maximum(x, 0.0) + jnp.log1p(t)
    sg = jnp.where(x >= 0.0, 1.0, t) * inv1pt
    return sp, sg


# -----------------------------------------------------------------------------
# Fused kernel: writes packed [dp | dq] of shape (n, qd + pd)
# -----------------------------------------------------------------------------
def _fused_kernel(v_ref, p_ref, q_ref, m_ref, mvw_ref, w_ref, out_ref):
    f32 = jnp.float32
    n, vd = v_ref.shape
    pd = p_ref.shape[1]
    qd = q_ref.shape[1]
    h = w_ref.shape[1]
    o1 = vd + pd
    o2 = o1 + vd + qd
    o3 = o2 + pd

    # x[i,c] . W[c,k]  (forward)   and   g[i,k] . Wt[d,k]  (backward / x @ W.T)
    dn_fwd = (((1,), (0,)), ((), ()))
    dn_bwd = (((1,), (1,)), ((), ()))

    # static slices of the packed weight slab  [ WT.T | W1.T | WF.T | b1 ]
    wt_v = w_ref[0:vd, :]            # [vd, h]
    wt_p = w_ref[vd:o1, :]           # [pd, h]
    w1_v = w_ref[o1:o1 + vd, :]      # [vd, h]
    w1_q = w_ref[o1 + vd:o2, :]      # [qd, h]
    wf_t = w_ref[o2:o3, :]           # [pd, h]
    b1 = w_ref[o3:o3 + 1, :]         # [1, h]

    m = m_ref[...]                   # [n, 1]
    two_inv_m = 2.0 / m
    p_val = p_ref[...]
    q_val = q_ref[...]
    v_sig = 1.0 / (1.0 + jnp.exp(-v_ref[...]))          # sigmoid(v), in-kernel

    # ---- Kinetic:  dq = (2/m) * (softplus(z)*sigmoid(z)) @ WT[:, vd:]
    z = (lax.dot_general(v_sig, wt_v, dn_fwd, preferred_element_type=f32)
         + lax.dot_general(p_val, wt_p, dn_fwd, preferred_element_type=f32))
    sp_z, sg_z = _softplus_sigmoid(z)
    dq = two_inv_m * lax.dot_general(sp_z * sg_z, wt_p, dn_bwd,
                                     preferred_element_type=f32)

    # ---- Dissipation:  m * dF/dp = (2/m) * (softplus(y)*sigmoid(y)) @ WF
    y = lax.dot_general(p_val, wf_t, dn_fwd, preferred_element_type=f32)
    sp_y, sg_y = _softplus_sigmoid(y)
    dp_diss = two_inv_m * lax.dot_general(sp_y * sg_y, wf_t, dn_bwd,
                                          preferred_element_type=f32)

    # ---- Potential gradient wrt q (no [n,n,h] tensor, no transposes)
    #   a_i = W1 [sigmoid(v_i); q_i],  u_j = a_j + b1,  root_ij = u_j - a_i
    a = (lax.dot_general(v_sig, w1_v, dn_fwd, preferred_element_type=f32)
         + lax.dot_general(q_val, w1_q, dn_fwd, preferred_element_type=f32))
    u = a + b1
    # centering is exact (s and root differences are shift-invariant) and
    # improves conditioning of the norm expansion.
    ctr = jnp.mean(a, axis=0, keepdims=True)
    a_c = a - ctr
    u_c = u - ctr

    a_sq = jnp.sum(a_c * a_c, axis=1, keepdims=True)                      # [n,1]
    ones_1h = jnp.ones((1, h), f32)
    u_sq_row = lax.dot_general(ones_1h, u_c * u_c, dn_bwd,
                               preferred_element_type=f32)                # [1,n]
    au = lax.dot_general(a_c, u_c, dn_bwd, preferred_element_type=f32)    # [n,n]
    # ||u_j - a_i||^2 via norm expansion; clamp against cancellation.
    s = jnp.maximum(a_sq + u_sq_row - 2.0 * au, 0.0)

    # specialized softplus/sigmoid for s >= 0: one exp, no abs/max/select
    t = jnp.exp(-s)
    sg_s = 1.0 / (1.0 + t)
    dist = s + jnp.log1p(t)            # softplus(s) >= ln 2 -> safe everywhere
    inv = 1.0 / dist
    gprime = inv * inv * (1.0 - 2.0 * inv)          # d/dD (D^-2 - D^-1)

    # pair mask  vvm * (m m^T)  with zeroed diagonal (replaces the eye blend);
    # single where on [n,n] (one iota pair) since the mask is built in-kernel.
    mvw_v = mvw_ref[...]
    vvm = lax.dot_general(mvw_v, mvw_v, (((0,), (0,)), ((), ())),
                          preferred_element_type=f32)                    # [n,n]
    mm = lax.dot_general(m, m, dn_bwd, preferred_element_type=f32)       # m m^T
    rows = lax.broadcasted_iota(jnp.int32, (n, n), 0)
    cols = lax.broadcasted_iota(jnp.int32, (n, n), 1)
    mask = jnp.where(rows == cols, 0.0, vvm * mm)

    c = mask * gprime * sg_s                                             # [n,n]

    # a_diff_k = colsum_k*u_k - (c^T a)_k - (c u)_k + rowsum_k*a_k
    ones_n1 = jnp.ones((n, 1), f32)
    colsum = lax.dot_general(c, ones_n1, (((0,), (0,)), ((), ())),
                             preferred_element_type=f32)                 # [n,1]
    rowsum = jnp.sum(c, axis=1, keepdims=True)                           # [n,1]
    ct_a = lax.dot_general(c, a_c, (((0,), (0,)), ((), ())),
                           preferred_element_type=f32)                   # [n,h]
    c_u = lax.dot_general(c, u_c, dn_fwd, preferred_element_type=f32)    # [n,h]
    a_diff = colsum * u_c - ct_a - c_u + rowsum * a_c
    gq = 2.0 * lax.dot_general(a_diff, w1_q, dn_bwd,
                               preferred_element_type=f32)

    dp = -(gq + dp_diss)

    # single lane-contiguous full-block store of packed [dp | dq]
    out_ref[...] = jnp.concatenate([dp, dq], axis=1)


def dissipative_hamiltonian_derivation(v, e, m, p, q, mvw, params):
    """Returns (dp, dq) exactly as the torch forward with default flags."""
    # e only appears as sigmoid(e) in the torch forward and never influences dp/dq.
    del e
    f32 = jnp.float32
    v, m, p, q, mvw = (jnp.asarray(x, f32) for x in (v, m, p, q, mvw))
    n, vd = v.shape
    pd = p.shape[1]
    qd = q.shape[1]
    assert pd == qd, "dp = -(dH/dq + dF/dp * m) requires p_dim == q_dim"

    WT = jnp.asarray(params["WT"], f32)   # [h, vd+pd]
    W1 = jnp.asarray(params["W1"], f32)   # [h, vd+qd]
    b1 = jnp.asarray(params["b1"], f32)   # [h]
    WF = jnp.asarray(params["WF"], f32)   # [h, pd]

    # Single packed weight slab (constant-folded under jit when params are
    # closed over): rows = [ WT.T | W1.T | WF.T | b1 ], shape [2*vd+2*pd+qd+1, h]
    wslab = jnp.concatenate([WT.T, W1.T, WF.T, b1.reshape(1, -1)], axis=0)

    vmem = pl.BlockSpec(memory_space=pltpu.MemorySpace.VMEM)
    out = pl.pallas_call(
        _fused_kernel,
        out_shape=jax.ShapeDtypeStruct((n, qd + pd), f32),
        in_specs=[vmem] * 6,
        out_specs=vmem,
    )(v, p, q, m, mvw, wslab)

    dp = out[:, :qd]
    dq = out[:, qd:]
    return dp, dq


if __name__ == "__main__":
    key = jax.random.PRNGKey(0)
    n, n_mol, n_edge = 8, 2, 10
    v_dim, e_dim, p_dim, q_dim, h_dim = 6, 5, 4, 4, 16

    ks = jax.random.split(key, 10)
    v = jax.random.normal(ks[0], (n, v_dim), jnp.float32)
    e = jax.random.normal(ks[1], (n_edge, e_dim), jnp.float32)
    m = jax.random.uniform(ks[2], (n, 1), jnp.float32, minval=0.5, maxval=2.0)
    p = jax.random.normal(ks[3], (n, p_dim), jnp.float32)
    q = jax.random.normal(ks[4], (n, q_dim), jnp.float32)
    mol_idx = jnp.array([0, 0, 0, 0, 1, 1, 1, 1])
    mvw = jax.nn.one_hot(mol_idx, n_mol, dtype=jnp.float32).T  # mol_vertex_w [n_mol, n]

    def init_linear(k, fan_out, fan_in):
        bound = 1.0 / np.sqrt(fan_in)
        return jax.random.uniform(k, (fan_out, fan_in), jnp.float32, -bound, bound)

    params = {
        "WT": init_linear(ks[5], h_dim, v_dim + p_dim),            # KineticEnergy.W
        "W1": init_linear(ks[6], h_dim, v_dim + q_dim),            # PotentialEnergy.linear1.weight
        "b1": jax.random.uniform(ks[7], (h_dim,), jnp.float32,
                                 -1.0 / np.sqrt(v_dim + q_dim),
                                 1.0 / np.sqrt(v_dim + q_dim)),    # PotentialEnergy.linear1.bias
        "WF": init_linear(ks[8], h_dim, p_dim),                    # DissipatedEnergy.W
    }

    run = jax.jit(lambda v_, e_, m_, p_, q_, w_: dissipative_hamiltonian_derivation(
        v_, e_, m_, p_, q_, w_, params))
    dp, dq = run(v, e, m, p, q, mvw)
    jax.block_until_ready((dp, dq))

    # ---- pure-JAX autodiff reference (mirrors the torch module exactly) ----
    def hamilton_sum(p_, q_):
        vs = _sigmoid(v)
        # Kinetic
        vp_ = jnp.concatenate([vs, p_], axis=1)
        z = vp_ @ params["WT"].T
        t = jnp.sum((1.0 / m) * _softplus(z) ** 2, axis=1, keepdims=True)
        # Potential
        vvm = mvw.T @ mvw
        mm = m * m.reshape(1, -1)
        vq_ = jnp.concatenate([vs, q_], axis=1)
        delta = vq_[None, :, :] - vq_[:, None, :]
        root = delta @ params["W1"].T + params["b1"]
        eye = jnp.eye(n, dtype=jnp.float32)
        dist = _softplus(jnp.sum(root ** 2, axis=2)) * (1.0 - eye) + eye
        energy = (vvm * mm) * (dist ** -2 - dist ** -1)
        u = jnp.sum(energy, axis=1, keepdims=True)
        return jnp.sum(t + u)

    def dissip_sum(p_):
        y = p_ @ params["WF"].T
        return jnp.sum((1.0 / m ** 2) * _softplus(y) ** 2)

    dq_ref = jax.grad(hamilton_sum, argnums=0)(p, q)
    dHdq = jax.grad(hamilton_sum, argnums=1)(p, q)
    dFdp = jax.grad(dissip_sum)(p)
    dp_ref = -(dHdq + dFdp * m)

    np.testing.assert_allclose(np.asarray(dq), np.asarray(dq_ref), rtol=5e-4, atol=2e-4)
    np.testing.assert_allclose(np.asarray(dp), np.asarray(dp_ref), rtol=5e-4, atol=2e-4)
    print("KERNEL_OK")
</pallas_src>

<mosaic_0001>
module attributes {stable_mosaic.version = 11 : i64} {
  func.func @_fused_kernel(%arg0: memref<8x6xf32, #tpu.memory_space<vmem>>, %arg1: memref<8x4xf32, #tpu.memory_space<vmem>>, %arg2: memref<8x4xf32, #tpu.memory_space<vmem>>, %arg3: memref<8x1xf32, #tpu.memory_space<vmem>>, %arg4: memref<2x8xf32, #tpu.memory_space<vmem>>, %arg5: memref<25x16xf32, #tpu.memory_space<vmem>>, %arg6: memref<8x8xf32, #tpu.memory_space<vmem>>) attributes {dimension_semantics = [], scalar_prefetch = 0 : i64, scratch_operands = 0 : i64, tpu.core_type = #tpu.core_type<tc>} {
    %c0 = arith.constant 0 : index
    %c0_0 = arith.constant 0 : index
    %0 = vector.load %arg5[%c0, %c0_0] : memref<25x16xf32, #tpu.memory_space<vmem>>, vector<6x16xf32>
    %c6 = arith.constant 6 : index
    %c0_1 = arith.constant 0 : index
    %1 = vector.load %arg5[%c6, %c0_1] : memref<25x16xf32, #tpu.memory_space<vmem>>, vector<4x16xf32>
    %c10 = arith.constant 10 : index
    %c0_2 = arith.constant 0 : index
    %2 = vector.load %arg5[%c10, %c0_2] : memref<25x16xf32, #tpu.memory_space<vmem>>, vector<6x16xf32>
    %c16 = arith.constant 16 : index
    %c0_3 = arith.constant 0 : index
    %3 = vector.load %arg5[%c16, %c0_3] : memref<25x16xf32, #tpu.memory_space<vmem>>, vector<4x16xf32>
    %c20 = arith.constant 20 : index
    %c0_4 = arith.constant 0 : index
    %4 = vector.load %arg5[%c20, %c0_4] : memref<25x16xf32, #tpu.memory_space<vmem>>, vector<4x16xf32>
    %c24 = arith.constant 24 : index
    %c0_5 = arith.constant 0 : index
    %5 = vector.load %arg5[%c24, %c0_5] : memref<25x16xf32, #tpu.memory_space<vmem>>, vector<1x16xf32>
    %c0_6 = arith.constant 0 : index
    %c0_7 = arith.constant 0 : index
    %6 = vector.load %arg3[%c0_6, %c0_7] : memref<8x1xf32, #tpu.memory_space<vmem>>, vector<8x1xf32>
    %cst = arith.constant 2.000000e+00 : f32
    %7 = vector.broadcast %cst : f32 to vector<8x1xf32>
    %8 = arith.divf %7, %6 : vector<8x1xf32>
    %c0_8 = arith.constant 0 : index
    %c0_9 = arith.constant 0 : index
    %9 = vector.load %arg1[%c0_8, %c0_9] : memref<8x4xf32, #tpu.memory_space<vmem>>, vector<8x4xf32>
    %c0_10 = arith.constant 0 : index
    %c0_11 = arith.constant 0 : index
    %10 = vector.load %arg2[%c0_10, %c0_11] : memref<8x4xf32, #tpu.memory_space<vmem>>, vector<8x4xf32>
    %c0_12 = arith.constant 0 : index
    %c0_13 = arith.constant 0 : index
    %11 = vector.load %arg0[%c0_12, %c0_13] : memref<8x6xf32, #tpu.memory_space<vmem>>, vector<8x6xf32>
    %cst_14 = arith.constant 0.000000e+00 : f32
    %12 = vector.broadcast %cst_14 : f32 to vector<8x6xf32>
    %13 = arith.subf %12, %11 : vector<8x6xf32>
    %14 = math.exp %13 : vector<8x6xf32>
    %cst_15 = arith.constant 1.000000e+00 : f32
    %15 = vector.broadcast %cst_15 : f32 to vector<8x6xf32>
    %16 = arith.addf %15, %14 : vector<8x6xf32>
    %cst_16 = arith.constant 1.000000e+00 : f32
    %17 = vector.broadcast %cst_16 : f32 to vector<8x6xf32>
    %18 = arith.divf %17, %16 : vector<8x6xf32>
    %cst_17 = arith.constant dense<0.000000e+00> : vector<8x16xf32>
    %19 = tpu.matmul %18, %0, %cst_17 {dimension_numbers = #tpu.dot_dimension_numbers<[1], [0], [0], [1], [0, 0, 1, 1], [], []>} : vector<8x6xf32>, vector<6x16xf32>, vector<8x16xf32> -> vector<8x16xf32>
    %cst_18 = arith.constant dense<0.000000e+00> : vector<8x16xf32>
    %20 = tpu.matmul %9, %1, %cst_18 {dimension_numbers = #tpu.dot_dimension_numbers<[1], [0], [0], [1], [0, 0, 1, 1], [], []>} : vector<8x4xf32>, vector<4x16xf32>, vector<8x16xf32> -> vector<8x16xf32>
    %21 = arith.addf %19, %20 : vector<8x16xf32>
    %22 = math.absf %21 : vector<8x16xf32>
    %cst_19 = arith.constant 0.000000e+00 : f32
    %23 = vector.broadcast %cst_19 : f32 to vector<8x16xf32>
    %24 = arith.subf %23, %22 : vector<8x16xf32>
    %25 = math.exp %24 : vector<8x16xf32>
    %cst_20 = arith.constant 1.000000e+00 : f32
    %26 = vector.broadcast %cst_20 : f32 to vector<8x16xf32>
    %27 = arith.addf %26, %25 : vector<8x16xf32>
    %cst_21 = arith.constant 1.000000e+00 : f32
    %28 = vector.broadcast %cst_21 : f32 to vector<8x16xf32>
    %29 = arith.divf %28, %27 : vector<8x16xf32>
    %cst_22 = arith.constant 0.000000e+00 : f32
    %30 = vector.broadcast %cst_22 : f32 to vector<8x16xf32>
    %31 = arith.maximumf %21, %30 : vector<8x16xf32>
    %32 = math.log1p %25 : vector<8x16xf32>
    %33 = arith.addf %31, %32 : vector<8x16xf32>
    %cst_23 = arith.constant 0.000000e+00 : f32
    %34 = vector.broadcast %cst_23 : f32 to vector<8x16xf32>
    %35 = arith.cmpf oge, %21, %34 : vector<8x16xf32>
    %cst_24 = arith.constant 1.000000e+00 : f32
    %36 = vector.broadcast %cst_24 : f32 to vector<8x16xf32>
    %37 = arith.select %35, %36, %25 : vector<8x16xi1>, vector<8x16xf32>
    %38 = arith.mulf %37, %29 : vector<8x16xf32>
    %39 = arith.mulf %33, %38 : vector<8x16xf32>
    %cst_25 = arith.constant dense<0.000000e+00> : vector<8x4xf32>
    %40 = tpu.matmul %39, %1, %cst_25 {dimension_numbers = #tpu.dot_dimension_numbers<[1], [1], [0], [0], [0, 0, 1, 0], [], []>} : vector<8x16xf32>, vector<4x16xf32>, vector<8x4xf32> -> vector<8x4xf32>
    %41 = vector.broadcast %8 : vector<8x1xf32> to vector<8x4xf32>
    %42 = arith.mulf %41, %40 : vector<8x4xf32>
    %cst_26 = arith.constant dense<0.000000e+00> : vector<8x16xf32>
    %43 = tpu.matmul %9, %4, %cst_26 {dimension_numbers = #tpu.dot_dimension_numbers<[1], [0], [0], [1], [0, 0, 1, 1], [], []>} : vector<8x4xf32>, vector<4x16xf32>, vector<8x16xf32> -> vector<8x16xf32>
    %44 = math.absf %43 : vector<8x16xf32>
    %cst_27 = arith.constant 0.000000e+00 : f32
    %45 = vector.broadcast %cst_27 : f32 to vector<8x16xf32>
    %46 = arith.subf %45, %44 : vector<8x16xf32>
    %47 = math.exp %46 : vector<8x16xf32>
    %cst_28 = arith.constant 1.000000e+00 : f32
    %48 = vector.broadcast %cst_28 : f32 to vector<8x16xf32>
    %49 = arith.addf %48, %47 : vector<8x16xf32>
    %cst_29 = arith.constant 1.000000e+00 : f32
    %50 = vector.broadcast %cst_29 : f32 to vector<8x16xf32>
    %51 = arith.divf %50, %49 : vector<8x16xf32>
    %cst_30 = arith.constant 0.000000e+00 : f32
    %52 = vector.broadcast %cst_30 : f32 to vector<8x16xf32>
    %53 = arith.maximumf %43, %52 : vector<8x16xf32>
    %54 = math.log1p %47 : vector<8x16xf32>
    %55 = arith.addf %53, %54 : vector<8x16xf32>
    %cst_31 = arith.constant 0.000000e+00 : f32
    %56 = vector.broadcast %cst_31 : f32 to vector<8x16xf32>
    %57 = arith.cmpf oge, %43, %56 : vector<8x16xf32>
    %cst_32 = arith.constant 1.000000e+00 : f32
    %58 = vector.broadcast %cst_32 : f32 to vector<8x16xf32>
    %59 = arith.select %57, %58, %47 : vector<8x16xi1>, vector<8x16xf32>
    %60 = arith.mulf %59, %51 : vector<8x16xf32>
    %61 = arith.mulf %55, %60 : vector<8x16xf32>
    %cst_33 = arith.constant dense<0.000000e+00> : vector<8x4xf32>
    %62 = tpu.matmul %61, %4, %cst_33 {dimension_numbers = #tpu.dot_dimension_numbers<[1], [1], [0], [0], [0, 0, 1, 0], [], []>} : vector<8x16xf32>, vector<4x16xf32>, vector<8x4xf32> -> vector<8x4xf32>
    %63 = vector.broadcast %8 : vector<8x1xf32> to vector<8x4xf32>
    %64 = arith.mulf %63, %62 : vector<8x4xf32>
    %cst_34 = arith.constant dense<0.000000e+00> : vector<8x16xf32>
    %65 = tpu.matmul %18, %2, %cst_34 {dimension_numbers = #tpu.dot_dimension_numbers<[1], [0], [0], [1], [0, 0, 1, 1], [], []>} : vector<8x6xf32>, vector<6x16xf32>, vector<8x16xf32> -> vector<8x16xf32>
    %cst_35 = arith.constant dense<0.000000e+00> : vector<8x16xf32>
    %66 = tpu.matmul %10, %3, %cst_35 {dimension_numbers = #tpu.dot_dimension_numbers<[1], [0], [0], [1], [0, 0, 1, 1], [], []>} : vector<8x4xf32>, vector<4x16xf32>, vector<8x16xf32> -> vector<8x16xf32>
    %67 = arith.addf %65, %66 : vector<8x16xf32>
    %68 = vector.broadcast %5 : vector<1x16xf32> to vector<8x16xf32>
    %69 = arith.addf %67, %68 : vector<8x16xf32>
    %cst_36 = arith.constant dense<0.000000e+00> : vector<16xf32>
    %70 = vector.multi_reduction <add>, %67, %cst_36 [0] : vector<8x16xf32> to vector<16xf32>
    %71 = vector.shape_cast %70 : vector<16xf32> to vector<1x16xf32>
    %cst_37 = arith.constant 8.000000e+00 : f32
    %72 = vector.broadcast %cst_37 : f32 to vector<1x16xf32>
    %73 = arith.divf %71, %72 : vector<1x16xf32>
    %74 = vector.broadcast %73 : vector<1x16xf32> to vector<8x16xf32>
    %75 = arith.subf %67, %74 : vector<8x16xf32>
    %76 = vector.broadcast %73 : vector<1x16xf32> to vector<8x16xf32>
    %77 = arith.subf %69, %76 : vector<8x16xf32>
    %78 = arith.mulf %75, %75 : vector<8x16xf32>
    %cst_38 = arith.constant dense<0.000000e+00> : vector<8xf32>
    %79 = vector.multi_reduction <add>, %78, %cst_38 [1] : vector<8x16xf32> to vector<8xf32>
    %80 = vector.shape_cast %79 : vector<8xf32> to vector<8x1xf32>
    %cst_39 = arith.constant 1.000000e+00 : f32
    %81 = vector.broadcast %cst_39 : f32 to vector<1x16xf32>
    %82 = arith.mulf %77, %77 : vector<8x16xf32>
    %cst_40 = arith.constant dense<0.000000e+00> : vector<1x8xf32>
    %83 = tpu.matmul %81, %82, %cst_40 {dimension_numbers = #tpu.dot_dimension_numbers<[1], [1], [0], [0], [0, 0, 1, 0], [], []>} : vector<1x16xf32>, vector<8x16xf32>, vector<1x8xf32> -> vector<1x8xf32>
    %cst_41 = arith.constant dense<0.000000e+00> : vector<8x8xf32>
    %84 = tpu.matmul %75, %77, %cst_41 {dimension_numbers = #tpu.dot_dimension_numbers<[1], [1], [0], [0], [0, 0, 1, 0], [], []>} : vector<8x16xf32>, vector<8x16xf32>, vector<8x8xf32> -> vector<8x8xf32>
    %85 = vector.broadcast %80 : vector<8x1xf32> to vector<8x8xf32>
    %86 = vector.broadcast %83 : vector<1x8xf32> to vector<8x8xf32>
    %87 = arith.addf %85, %86 : vector<8x8xf32>
    %cst_42 = arith.constant 2.000000e+00 : f32
    %88 = vector.broadcast %cst_42 : f32 to vector<8x8xf32>
    %89 = arith.mulf %88, %84 : vector<8x8xf32>
    %90 = arith.subf %87, %89 : vector<8x8xf32>
    %cst_43 = arith.constant 0.000000e+00 : f32
    %91 = vector.broadcast %cst_43 : f32 to vector<8x8xf32>
    %92 = arith.maximumf %90, %91 : vector<8x8xf32>
    %cst_44 = arith.constant 0.000000e+00 : f32
    %93 = vector.broadcast %cst_44 : f32 to vector<8x8xf32>
    %94 = arith.subf %93, %92 : vector<8x8xf32>
    %95 = math.exp %94 : vector<8x8xf32>
    %cst_45 = arith.constant 1.000000e+00 : f32
    %96 = vector.broadcast %cst_45 : f32 to vector<8x8xf32>
    %97 = arith.addf %96, %95 : vector<8x8xf32>
    %cst_46 = arith.constant 1.000000e+00 : f32
    %98 = vector.broadcast %cst_46 : f32 to vector<8x8xf32>
    %99 = arith.divf %98, %97 : vector<8x8xf32>
    %100 = math.log1p %95 : vector<8x8xf32>
    %101 = arith.addf %92, %100 : vector<8x8xf32>
    %cst_47 = arith.constant 1.000000e+00 : f32
    %102 = vector.broadcast %cst_47 : f32 to vector<8x8xf32>
    %103 = arith.divf %102, %101 : vector<8x8xf32>
    %104 = arith.mulf %103, %103 : vector<8x8xf32>
    %cst_48 = arith.constant 2.000000e+00 : f32
    %105 = vector.broadcast %cst_48 : f32 to vector<8x8xf32>
    %106 = arith.mulf %105, %103 : vector<8x8xf32>
    %cst_49 = arith.constant 1.000000e+00 : f32
    %107 = vector.broadcast %cst_49 : f32 to vector<8x8xf32>
    %108 = arith.subf %107, %106 : vector<8x8xf32>
    %109 = arith.mulf %104, %108 : vector<8x8xf32>
    %c0_50 = arith.constant 0 : index
    %c0_51 = arith.constant 0 : index
    %110 = vector.load %arg4[%c0_50, %c0_51] : memref<2x8xf32, #tpu.memory_space<vmem>>, vector<2x8xf32>
    %cst_52 = arith.constant dense<0.000000e+00> : vector<8x8xf32>
    %111 = tpu.matmul %110, %110, %cst_52 {dimension_numbers = #tpu.dot_dimension_numbers<[0], [0], [1], [1], [0, 1, 1, 1], [], []>} : vector<2x8xf32>, vector<2x8xf32>, vector<8x8xf32> -> vector<8x8xf32>
    %cst_53 = arith.constant dense<0.000000e+00> : vector<8x8xf32>
    %112 = tpu.matmul %6, %6, %cst_53 {dimension_numbers = #tpu.dot_dimension_numbers<[1], [1], [0], [0], [0, 0, 1, 0], [], []>} : vector<8x1xf32>, vector<8x1xf32>, vector<8x8xf32> -> vector<8x8xf32>
    %113 = tpu.iota {dimensions = array<i32: 0>} : vector<8x8xi32>
    %114 = tpu.iota {dimensions = array<i32: 1>} : vector<8x8xi32>
    %115 = arith.cmpi eq, %113, %114 : vector<8x8xi32>
    %116 = arith.mulf %111, %112 : vector<8x8xf32>
    %cst_54 = arith.constant 0.000000e+00 : f32
    %117 = vector.broadcast %cst_54 : f32 to vector<8x8xf32>
    %118 = arith.select %115, %117, %116 : vector<8x8xi1>, vector<8x8xf32>
    %119 = arith.mulf %118, %109 : vector<8x8xf32>
    %120 = arith.mulf %119, %99 : vector<8x8xf32>
    %cst_55 = arith.constant 1.000000e+00 : f32
    %121 = vector.broadcast %cst_55 : f32 to vector<8x1xf32>
    %cst_56 = arith.constant dense<0.000000e+00> : vector<8x1xf32>
    %122 = tpu.matmul %120, %121, %cst_56 {dimension_numbers = #tpu.dot_dimension_numbers<[0], [0], [1], [1], [0, 1, 1, 1], [], []>} : vector<8x8xf32>, vector<8x1xf32>, vector<8x1xf32> -> vector<8x1xf32>
    %cst_57 = arith.constant dense<0.000000e+00> : vector<8xf32>
    %123 = vector.multi_reduction <add>, %120, %cst_57 [1] : vector<8x8xf32> to vector<8xf32>
    %124 = vector.shape_cast %123 : vector<8xf32> to vector<8x1xf32>
    %cst_58 = arith.constant dense<0.000000e+00> : vector<8x16xf32>
    %125 = tpu.matmul %120, %75, %cst_58 {dimension_numbers = #tpu.dot_dimension_numbers<[0], [0], [1], [1], [0, 1, 1, 1], [], []>} : vector<8x8xf32>, vector<8x16xf32>, vector<8x16xf32> -> vector<8x16xf32>
    %cst_59 = arith.constant dense<0.000000e+00> : vector<8x16xf32>
    %126 = tpu.matmul %120, %77, %cst_59 {dimension_numbers = #tpu.dot_dimension_numbers<[1], [0], [0], [1], [0, 0, 1, 1], [], []>} : vector<8x8xf32>, vector<8x16xf32>, vector<8x16xf32> -> vector<8x16xf32>
    %127 = vector.broadcast %122 : vector<8x1xf32> to vector<8x16xf32>
    %128 = arith.mulf %127, %77 : vector<8x16xf32>
    %129 = arith.subf %128, %125 : vector<8x16xf32>
    %130 = arith.subf %129, %126 : vector<8x16xf32>
    %131 = vector.broadcast %124 : vector<8x1xf32> to vector<8x16xf32>
    %132 = arith.mulf %131, %75 : vector<8x16xf32>
    %133 = arith.addf %130, %132 : vector<8x16xf32>
    %cst_60 = arith.constant dense<0.000000e+00> : vector<8x4xf32>
    %134 = tpu.matmul %133, %3, %cst_60 {dimension_numbers = #tpu.dot_dimension_numbers<[1], [1], [0], [0], [0, 0, 1, 0], [], []>} : vector<8x16xf32>, vector<4x16xf32>, vector<8x4xf32> -> vector<8x4xf32>
    %cst_61 = arith.constant 2.000000e+00 : f32
    %135 = vector.broadcast %cst_61 : f32 to vector<8x4xf32>
    %136 = arith.mulf %135, %134 : vector<8x4xf32>
    %137 = arith.addf %136, %64 : vector<8x4xf32>
    %cst_62 = arith.constant 0.000000e+00 : f32
    %138 = vector.broadcast %cst_62 : f32 to vector<8x4xf32>
    %139 = arith.subf %138, %137 : vector<8x4xf32>
    %140 = tpu.concatenate %139, %42 in 1 : vector<8x4xf32>, vector<8x4xf32> -> vector<8x8xf32>
    %c0_63 = arith.constant 0 : index
    %c0_64 = arith.constant 0 : index
    %141 = vector.load %arg6[%c0_63, %c0_64] : memref<8x8xf32, #tpu.memory_space<vmem>>, vector<8x8xf32>
    tpu.vector_store %arg6[%c0_63, %c0_64], %140 {strides = array<i32>} : memref<8x8xf32, #tpu.memory_space<vmem>>, vector<8x8xf32>,
    return
  }
}

</mosaic_0001>

<bundles_post_ra>
// kernel: _lambda_.1
= control target key start
LH: loop header
LB: loop body
LE: loop exit
PB: predicated region body
PF: predicated region fallthrough
CT: control target
= control target key end

     0   :  { %vm45_vm0 = vcmask 1043456   ;;  %vm41_vm1 = vcmask 31744   ;;  %v1538_v0 = vmov 0.0   ;;  %vm1539_vm2 = vmmov 0   ;;  %s1713_s5 = inlined_call_operand.vmem [shape: f32[25,16], index: 5, kind: input, shape index: {}]   ;;  %s1714_s1 = inlined_call_operand.vmem [shape: f32[8,4], index: 1, kind: input, shape index: {}]   ;;  %s1715_s0 = inlined_call_operand.vmem [shape: f32[8,6], index: 0, kind: input, shape index: {}]   ;;  %s1716_s4 = inlined_call_operand.vmem [shape: f32[2,8], index: 4, kind: input, shape index: {}]   ;;  %s1717_s2 = inlined_call_operand.vmem [shape: f32[8,4], index: 2, kind: input, shape index: {}]   ;;  %s1718_s3 = inlined_call_operand.vmem [shape: f32[8,1], index: 3, kind: input, shape index: {}]   ;;  %s1719_s6 = inlined_call_operand.vmem [shape: f32[8,8], index: 6, kind: output, shape index: {}]  }
   0x1   :  { %1426 = vmatprep.subr.mxu0 %v1538_v0  ;;  %v24_v1 = vld [vmem:[%s1713_s5 + $0x6] sm:$0xf]  ;;  %1428 = vmatprep.mubr.msk.f32.mxu0 %vm1539_vm2, %v1538_v0  ;;  %v23_v3 = vld [vmem:[%s1713_s5] sm:$0x3f]  ;;  %vm123_vm3 = vcmask 1045504   ;;  %vm119_vm4 = vcmask 48128  }
   0x2   :  { %v32_v2 = vld [vmem:[%s1714_s1] sm:$0xff]  ;;  %1427 = vmatpush3.msk.msra.mxu0 %vm45_vm0, %v24_v1  ;;  %1436 = vmatprep.subr.mxu1 %v1538_v0  ;;  %vm219_vm5 = vcmask 130048   ;;  %v27_v10 = vld [vmem:[%s1713_s5 + $0x14] sm:$0xf]  ;;  %v1624_v32 = vld [vmem:[%s1713_s5 + $0x10] sm:$0xf] }
   0x3   :  { %v34_v4 = vld [vmem:[%s1715_s0] sm:$0xff]  ;;  %1431 = vmatprep.subr.mxu0 %v1538_v0  ;;  %1429 = vmatmul.mubr.msk.f32.vlgmr.msra.gmra.mrb[0].mxu0 %vm41_vm1, %v32_v2  ;;  %v25_v34 = vld [vmem:[%s1713_s5 + $0xa] sm:$0x3f]  ;;  %v1540_v35 = vmov 0   ;;  %vm861_vm8 = vcmask 1041408   ;;  %vm857_vm9 = vcmask 15360  }
   0x4   :  { %v35_v5 = vsub.f32 0.0, %v34_v4  ;;  %1432 = vmatpush3.msk.msra.mxu0 %vm123_vm3, %v23_v3  ;;  %1433 = vmatprep.mubr.msk.f32.mxu0 %vm1539_vm2, %v1538_v0  ;;  %v824_v11 = vld [vmem:[%s1716_s4] sm:$0x3]  ;;  %v1541_v37 = vmov 1.0   ;;  %v1382_v60 = vld [vmem:[%s1713_s5 + $0x18] ss:$0 sm:$0xff] }
   0x5   :  { %1438 = vmatprep.mubr.msk.f32.mxu1 %vm1539_vm2, %v1538_v0  ;;  %1446 = vmatprep.subr.mxu0 %v1538_v0  ;;  %v33_v33 = vld [vmem:[%s1717_s2] sm:$0xff]  ;;  %vm935_vm12 = vcmask 7168   ;;  %vm1050_vm15 = vcmask 64512  }
   0x6   :  { %v36_v6 = vmul.f32 1.442695, %v35_v5  ;;  %1437 = vmatpush3.xpose.msk.msra.mxu1 %vm219_vm5, %v24_v1  ;;  %825 = vxpose.xlu0.b32.start.end [1/1] (short) (narrow) %v824_v11, 8 }
   0x7   :  { %1441 = vmatprep.subr.mxu1 %v1538_v0 }
   0x8   :  { %1512 = vpow2.f32 %v36_v6 }
  0x12   :  { %v1513_v7 = vpop.eup %1512 }
  0x13   :  { %v38_v8 = vadd.f32 1.0, %v1513_v7 }
  0x15   :  { %1514 = vrcp.f32 %v38_v8 }
  0x1f   :  { %v1515_v9 = vpop.eup %1514 }
  0x20   :  { %1434 = vmatmul.mubr.msk.f32.vlgmr.msra.gmra.mrb[0].mxu0 %vm119_vm4, %v1515_v9 }
  0x21   :  { %1448 = vmatprep.mubr.msk.f32.mxu0 %vm1539_vm2, %v1538_v0  ;;  %1447 = vmatpush3.xpose.msk.msra.mxu0 %vm219_vm5, %v27_v10 }
  0x22   :  { %1461 = vmatprep.subr.mxu0 %v1538_v0 }
  0x2f   :  { %1511 = vset.pattern.permute.xlu0 %v1540_v35 }
  0x86   :  { %v841_v36 = vpop.trf.xlu0 }
  0xf3   :  { %v193_v12 = vpop.f32.mrb[0].mxu0 }
  0xf4   :  { %v197_v13 = vand.u32 2147483647, %v193_v12  ;;  %v1435_v14 = vpop.f32.mrb[1].mxu0  ;;  %v204_v26 = vmax.f32 %v193_v12, 0.0  ;;  %vm215_vm7 = vcmp.ge.f32.partialorder %v193_v12, 0.0  ;;  %v29_v12 = vld [vmem:[%s1718_s3] sm:$0xff] }
  0xf5   :  { %s1542_s3 = smov 4  }
  0xf6   :  { %v198_v15 = vsub.f32 0.0, %v197_v13 }
  0xf8   :  { %v199_v16 = vmul.f32 1.442695, %v198_v15 }
  0xfa   :  { %1516 = vpow2.f32 %v199_v16 }
 0x104   :  { %v1517_v17 = vpop.eup %1516 }
 0x105   :  { %v201_v18 = vadd.f32 1.0, %v1517_v17  ;;  %v208_v19 = vmul.f32 -0.5, %v1517_v17  ;;  %v211_v21 = vand.u32 2147483647, %v1517_v17  ;;  %v216_v28 = vsel %vm215_vm7, 1.0, %v1517_v17 }
 0x107   :  { %1518 = vlog2.f32 %v201_v18  ;;  %v209_v20 = vadd.f32 1.0, %v208_v19  ;;  %vm212_vm6 = vcmp.lt.f32.partialorder %v211_v21, 0.0004427343  ;;  %v794_v19 = vlaneseq }
 0x108   :  { %1520 = vrcp.f32 %v201_v18 }
 0x109   :  { %v210_v25 = vmul.f32 %v1517_v17, %v209_v20  ;;  %v795_v20 = vshrl.u32 %v794_v19, 7 }
 0x111   :  { %v1519_v22 = vpop.eup %1518 }
 0x112   :  { %v1521_v23 = vpop.eup %1520  ;;  %v207_v24 = vmul.f32 0.6931472, %v1519_v22 }
 0x113   :  { %v217_v30 = vmul.f32 %v1521_v23, %v216_v28  ;;  %v796_v23 = vsub.s32 0, %v795_v20 }
 0x114   :  { %v213_v27 = vsel %vm212_vm6, %v210_v25, %v207_v24 }
 0x115   :  { %v214_v29 = vadd.f32 %v213_v27, %v204_v26 }
 0x117   :  { %v218_v31 = vmul.f32 %v217_v30, %v214_v29 }
 0x119   :  { %1439 = vmatmul.mubr.msk.f32.vlgmr.msra.gmra.mrb[0].mxu1 %vm219_vm5, %v218_v31 }
 0x11a   :  { %1442 = vmatpush3.msk.msra.mxu1 %vm45_vm0, %v27_v10  ;;  %1443 = vmatprep.mubr.msk.f32.mxu1 %vm1539_vm2, %v1538_v0 }
 0x11b   :  { %1451 = vmatprep.subr.mxu1 %v1538_v0 }
 0x11d   :  { %1444 = vmatmul.mubr.msk.f32.vlgmr.msra.gmra.mrb[2].mxu1 %vm41_vm1, %v32_v2 }
 0x11e   :  { %1452 = vmatpush3.msk.msra.mxu1 %vm45_vm0, %v1624_v32  ;;  %1453 = vmatprep.mubr.msk.f32.mxu1 %vm1539_vm2, %v1538_v0 }
 0x11f   :  { %1456 = vmatprep.subr.mxu1 %v1538_v0 }
 0x121   :  { %1454 = vmatmul.mubr.msk.f32.vlgmr.msra.gmra.mrb[4].mxu1 %vm41_vm1, %v33_v33 }
 0x122   :  { %1457 = vmatpush3.msk.msra.mxu1 %vm123_vm3, %v25_v34  ;;  %1458 = vmatprep.mubr.msk.f32.mxu1 %vm1539_vm2, %v1538_v0 }
 0x123   :  { %1471 = vmatprep.subr.mxu1 %v1538_v0 }
 0x129   :  { %1459 = vmatmul.mubr.msk.f32.vlgmr.msra.gmra.mrb[4].mxu1 %vm119_vm4, %v1515_v9 }
 0x12a   :  { %1473 = vmatprep.mubr.msk.f32.mxu1 %vm1539_vm2, %v1538_v0  ;;  %1472 = vmatpush3.msk.msra.mxu1 %vm861_vm8, %v824_v11 }
 0x12b   :  { %1481 = vmatprep.subr.mxu1 %v1538_v0 }
 0x12d   :  { %1474 = vmatmul.mubr.msk.f32.vlgmr.msra.gmra.mrb[6].mxu1 %vm857_vm9, %v841_v36 }
 0x12e   :  { %1482 = vmatpush3.msra.mxu1 %v1541_v37  ;;  %1483 = vmatprep.mubr.msk.f32.mxu1 %vm1539_vm2, %v1538_v0 }
 0x12f   :  { %1491 = vmatprep.subr.mxu1 %v1538_v0 }
 0x1ec   :  { %v1651_v38 = vpop.f32.mrb[0].mxu1 }
 0x1ed   :  { %v1440_v39 = vpop.f32.mrb[1].mxu1 }
 0x1f0   :  { %v370_v40 = vpop.f32.mrb[2].mxu1 }
 0x1f1   :  { %v374_v41 = vand.u32 2147483647, %v370_v40  ;;  %v1445_v42 = vpop.f32.mrb[3].mxu1  ;;  %v381_v5 = vmax.f32 %v370_v40, 0.0  ;;  %vm392_vm11 = vcmp.ge.f32.partialorder %v370_v40, 0.0 }
 0x1f3   :  { %v375_v43 = vsub.f32 0.0, %v374_v41 }
 0x1f5   :  { %v376_v44 = vmul.f32 1.442695, %v375_v43 }
 0x1f7   :  { %1522 = vpow2.f32 %v376_v44 }
 0x1fc   :  { %v617_v45 = vpop.f32.mrb[4].mxu1 }
 0x1fd   :  { %v626_v46 = vsel %vm219_vm5, %v617_v45, 0.0  ;;  %v1460_v47 = vpop.f32.mrb[5].mxu1  ;;  %v625_v4 = vadd.f32 %v1382_v60, %v617_v45 }
 0x1fe   :  { %v627_v48 = vrot.slane %v626_v46, 4 }
 0x200   :  { %v628_v49 = vadd.f32 %v627_v48, %v626_v46  ;;  %v931_v17 = vpop.f32.mrb[6].mxu1 }
 0x201   :  { %v1523_v50 = vpop.eup %1522  ;;  %v1475_v18 = vpop.f32.mrb[7].mxu1 }
 0x202   :  { %v378_v51 = vadd.f32 1.0, %v1523_v50  ;;  %v629_v52 = vrot.slane %v628_v49, 2  ;;  %v385_v55 = vmul.f32 -0.5, %v1523_v50  ;;  %v388_v59 = vand.u32 2147483647, %v1523_v50 }
 0x203   :  { %v393_v8 = vsel %vm392_vm11, 1.0, %v1523_v50 }
 0x204   :  { %1524 = vlog2.f32 %v378_v51  ;;  %v630_v53 = vadd.f32 %v629_v52, %v628_v49  ;;  %v386_v58 = vadd.f32 1.0, %v385_v55  ;;  %vm389_vm10 = vcmp.lt.f32.partialorder %v388_v59, 0.0004427343 }
 0x205   :  { %1526 = vrcp.f32 %v378_v51  ;;  %v1012_v52 = vand.u32 127, %v794_v19 }
 0x206   :  { %v631_v54 = vrot.slane %v630_v53, 1  ;;  %v387_v3 = vmul.f32 %v1523_v50, %v386_v58  ;;  %1528 = vrcp.f32 %v29_v12 }
 0x207   :  { %vm1013_vm14 = vcmp.eq.s32.totalorder %v795_v20, %v1012_v52 }
 0x208   :  { %v632_v56 = vadd.f32 %v631_v54, %v630_v53 }
 0x20a   :  { %v634_v57 = vmul.f32 0.125, %v632_v56 }
 0x20c   :  { %v1657_v61 = vsub.f32 %v617_v45, %v634_v57  ;;  %v1662_v9 = vsub.f32 %v625_v4, %v634_v57 }
 0x20e   :  { %v1525_v62 = vpop.eup %1524  ;;  %v637_v63 = vmul.f32 %v1657_v61, %v1657_v61  ;;  %v641_v14 = vmul.f32 %v1662_v9, %v1662_v9 }
 0x20f   :  { %v1527_v1 = vpop.eup %1526  ;;  %v384_v2 = vmul.f32 0.6931472, %v1525_v62 }
 0x210   :  { %v638_v6 = vsel %vm219_vm5, %v637_v63, 0.0  ;;  %v394_v11 = vmul.f32 %v1527_v1, %v393_v8  ;;  %v1529_v15 = vpop.eup %1528 }
 0x211   :  { %v390_v7 = vsel %vm389_vm10, %v387_v3, %v384_v2  ;;  %639 = vadd.xlane.f32.xlu0 %v638_v6  ;;  %v31_v16 = vmul.f32 2.0, %v1529_v15 }
 0x212   :  { %v391_v10 = vadd.f32 %v390_v7, %v381_v5 }
 0x214   :  { %v395_v13 = vmul.f32 %v394_v11, %v391_v10 }
 0x216   :  { %1449 = vmatmul.mubr.msk.f32.vlgmr.msra.gmra.mrb[2].mxu0 %vm219_vm5, %v395_v13 }
 0x217   :  { %1462 = vmatpush3.xpose.msk.msra.mxu0 %vm219_vm5, %v641_v14  ;;  %1463 = vmatprep.mubr.msk.f32.mxu0 %vm1539_vm2, %v1538_v0 }
 0x218   :  { %1466 = vmatprep.subr.mxu0 %v1538_v0 }
 0x21a   :  { %1464 = vmatmul.mubr.msk.f32.vlgmr.msra.gmra.mrb[4].mxu0 %vm219_vm5, %v1541_v37 }
 0x21b   :  { %1467 = vmatpush3.xpose.msk.msra.mxu0 %vm219_vm5, %v1662_v9  ;;  %1468 = vmatprep.mubr.msk.f32.mxu0 %vm1539_vm2, %v1538_v0 }
 0x21c   :  { %1476 = vmatprep.subr.mxu0 %v1538_v0 }
 0x21e   :  { %1469 = vmatmul.mubr.msk.f32.vlgmr.msra.gmra.mrb[6].mxu0 %vm219_vm5, %v1657_v61 }
 0x21f   :  { %1477 = vmatpush3.xpose.msk.msra.mxu0 %vm935_vm12, %v29_v12  ;;  %1478 = vmatprep.mubr.msk.f32.mxu0 %vm1539_vm2, %v1538_v0 }
 0x220   :  { %1486 = vmatprep.subr.mxu0 %v1538_v0 }
 0x222   :  { %1479 = vmatmul.mubr.msk.f32.vlgmr.msra.gmra.mrb[8].mxu0 %vm935_vm12, %v29_v12 }
 0x223   :  { %1487 = vmatpush3.msra.mxu0 %v1657_v61  ;;  %1488 = vmatprep.mubr.msk.f32.mxu0 %vm1539_vm2, %v1538_v0 }
 0x224   :  { %1496 = vmatprep.subr.mxu0 %v1538_v0 }
 0x227   :  { %297 = vperm.xlu0 %1511, %v31_v16  }
 0x29e   :  { %v640_v27 = vpop.xlane.xlu0 %639 }
 0x2e9   :  { %v1689_v21 = vpop.f32.mrb[2].mxu0 }
 0x2ea   :  { %v1450_v22 = vpop.f32.mrb[3].mxu0 }
 0x2ed   :  { %v714_v24 = vpop.f32.mrb[4].mxu0 }
 0x2ee   :  { %v797_v25 = vrot.slane %v714_v24, %v796_v23  ;;  %v1465_v26 = vpop.f32.mrb[5].mxu0 }
 0x2f0   :  { %v798_v29 = vadd.f32 %v797_v25, %v640_v27 }
 0x2f1   :  { %v790_v28 = vpop.f32.mrb[6].mxu0 }
 0x2f2   :  { %v799_v30 = vmul.f32 2.0, %v790_v28  ;;  %v1470_v31 = vpop.f32.mrb[7].mxu0 }
 0x2f4   :  { %v800_v33 = vsub.f32 %v798_v29, %v799_v30 }
 0x2f5   :  { %v1005_v34 = vpop.f32.mrb[8].mxu0 }
 0x2f6   :  { %v801_v36 = vmax.f32 %v800_v33, 0.0  ;;  %v1014_v37 = vmul.f32 %v1005_v34, %v931_v17  ;;  %v1480_v39 = vpop.f32.mrb[9].mxu0 }
 0x2f8   :  { %v802_v40 = vsub.f32 0.0, %v801_v36  ;;  %v1015_v57 = vsel %vm1013_vm14, 0.0, %v1014_v37 }
 0x2fa   :  { %v803_v41 = vmul.f32 1.442695, %v802_v40 }
 0x2fc   :  { %1530 = vpow2.f32 %v803_v41 }
 0x306   :  { %v1531_v42 = vpop.eup %1530 }
 0x307   :  { %v805_v43 = vadd.f32 1.0, %v1531_v42  ;;  %v811_v44 = vmul.f32 -0.5, %v1531_v42  ;;  %v814_v46 = vand.u32 2147483647, %v1531_v42 }
 0x309   :  { %1532 = vlog2.f32 %v805_v43  ;;  %v812_v45 = vadd.f32 1.0, %v811_v44  ;;  %vm815_vm13 = vcmp.lt.f32.partialorder %v814_v46, 0.0004427343 }
 0x30b   :  { %v813_v49 = vmul.f32 %v1531_v42, %v812_v45 }
 0x313   :  { %v1533_v47 = vpop.eup %1532 }
 0x314   :  { %v810_v48 = vmul.f32 0.6931472, %v1533_v47 }
 0x316   :  { %v816_v50 = vsel %vm815_vm13, %v813_v49, %v810_v48 }
 0x317   :  { %v817_v51 = vadd.f32 %v816_v50, %v801_v36 }
 0x319   :  { %1534 = vrcp.f32 %v817_v51 }
 0x31a   :  { %1536 = vrcp.f32 %v805_v43 }
 0x323   :  { %v1535_v53 = vpop.eup %1534 }
 0x324   :  { %v821_v54 = vmul.f32 2.0, %v1535_v53  ;;  %v820_v55 = vmul.f32 %v1535_v53, %v1535_v53  ;;  %v1537_v60 = vpop.eup %1536 }
 0x326   :  { %v822_v56 = vsub.f32 1.0, %v821_v54 }
 0x328   :  { %v823_v58 = vmul.f32 %v822_v56, %v820_v55 }
 0x32a   :  { %v1016_v59 = vmul.f32 %v1015_v57, %v823_v58 }
 0x32c   :  { %v1017_v62 = vmul.f32 %v1537_v60, %v1016_v59 }
 0x32e   :  { %1018 = vxpose.xlu1.b32.start.end [1/1] (short) (narrow) %v1017_v62, 8  ;;  %v1124_v63 = vsel %vm1050_vm15, %v1017_v62, 0.0 }
 0x34c   :  { %1510 = vset.pattern.permute.xlu1 %v1540_v35  ;;  %v298_v35 = vpop.permute.xlu0 %297 }
 0x34d   :  { %v300_v6 = vmul.f32 %v298_v35, %v1651_v38  ;;  %v471_v16 = vmul.f32 %v1689_v21, %v298_v35 }
 0x355   :  { %1125 = vadd.xlane.f32.xlu1 %v1124_v63 }
 0x3ae   :  { %v1034_v1 = vpop.trf.xlu1 }
 0x3af   :  { %1484 = vmatmul.mubr.msk.f32.vlgmr.msra.gmra.mrb[8].mxu1 %vm1050_vm15, %v1034_v1  ;;  %1489 = vmatmul.mubr.msk.f32.vlgmr.msra.gmra.mrb[10].mxu0 %vm1050_vm15, %v1034_v1 }
 0x3b0   :  { %1492 = vmatpush3.msra.mxu1 %v1662_v9  ;;  %1493 = vmatprep.mubr.msk.f32.mxu1 %vm1539_vm2, %v1538_v0 }
 0x3b1   :  { %1497 = vmatpush3.xpose.msk.msra.mxu0 %vm219_vm5, %v1624_v32  ;;  %1498 = vmatprep.mubr.msk.f32.mxu0 %vm1539_vm2, %v1538_v0 }
 0x3b3   :  { %1494 = vmatmul.mubr.msk.f32.vlgmr.msra.gmra.mrb[10].mxu1 %vm1050_vm15, %v1017_v62 }
 0x3e2   :  { %v1126_v10 = vpop.xlane.xlu1 %1125 }
 0x3e3   :  { %v1278_v0 = vmul.f32 %v1126_v10, %v1657_v61 }
 0x482   :  { %v1120_v2 = vpop.f32.mrb[8].mxu1  ;;  %v1193_v3 = vpop.f32.mrb[10].mxu0 }
 0x483   :  { %v1485_v4 = vpop.f32.mrb[9].mxu1  ;;  %1272 = vperm.xlu1 %1510, %v1120_v2   ;;  %v1490_v5 = vpop.f32.mrb[11].mxu0 }
 0x486   :  { %v1266_v7 = vpop.f32.mrb[10].mxu1 }
 0x487   :  { %v1495_v8 = vpop.f32.mrb[11].mxu1  ;;  %1359 = vrot.lane.b32.xlu1 %v300_v6, %s1542_s3 }
 0x502   :  { %v1273_v11 = vpop.permute.xlu1 %1272 }
 0x503   :  { %v1275_v32 = vmul.f32 %v1273_v11, %v1662_v9 }
 0x505   :  { %v1276_v12 = vsub.f32 %v1275_v32, %v1193_v3 }
 0x506   :  { %v1360_v20 = vpop.permute.xlu1 %1359 }
 0x507   :  { %v1277_v13 = vsub.f32 %v1276_v12, %v1266_v7 }
 0x509   :  { %v1279_v14 = vadd.f32 %v1278_v0, %v1277_v13 }
 0x50b   :  { %1499 = vmatmul.mubr.msk.f32.vlgmr.msra.gmra.mrb[12].mxu0 %vm219_vm5, %v1279_v14 }
 0x5de   :  { %v1351_v15 = vpop.f32.mrb[12].mxu0 }
 0x5df   :  { %v1355_v17 = vmul.f32 2.0, %v1351_v15  ;;  %v1500_v38 = vpop.f32.mrb[13].mxu0 }
 0x5e1   :  { %v1356_v18 = vadd.f32 %v1355_v17, %v471_v16 }
 0x5e3   :  { %v1357_v19 = vsub.f32 0.0, %v1356_v18 }
 0x5e5   :  { %v1362_v22 = vsel %vm41_vm1, %v1357_v19, %v1360_v20 }
 0x5e6   :  { %1363 = vst.msk [vmem:[%s1719_s6] sm:$0xff] %vm1050_vm15, %v1362_v22 }

</bundles_post_ra>
